<compile_context>
chip_gen: v5e
topology: v5e:2x2
jax: 0.10.0
libtpu: 0.0.40
codegen_flags: <defaults>
</compile_context>

<pallas_src>
import jax
import jax.numpy as jnp
from jax.experimental import pallas as pl
from jax.experimental.pallas import tpu as pltpu

INPUT_SIZE = 4    # CartPole-v1 observation_space.shape[0]
HIDDEN = 128
OUTPUT_SIZE = 2   # CartPole-v1 action_space.n

# Cap chosen so x-tile + output slab + two [TILE_B,128] f32 intermediates
# (with double buffering on x/out) stay far below v7x's 32 MiB scoped VMEM.
MAX_TILE_B = 1024


def _round_up(x, m):
    return ((x + m - 1) // m) * m


def _dqn_kernel(x_ref, w1_ref, b1_ref, w2_ref, b2_ref, w3_ref, b3_ref, o_ref):
    x = x_ref[...]                                              # [TB, 4]

    # fc1: K=4 contraction -> VPU broadcast-FMA (static 4-step unroll) rather
    # than an MXU matmul whose contraction dim would be almost all padding.
    acc = jnp.broadcast_to(b1_ref[...], (x.shape[0], HIDDEN)).astype(jnp.float32)
    for k in range(INPUT_SIZE):
        acc = acc + x[:, k:k + 1] * w1_ref[k:k + 1, :]
    h1 = jnp.maximum(acc, 0.0)                                  # [TB, 128]

    # fc2: 128x128 -> proper MXU work.
    h2 = jnp.dot(h1, w2_ref[...], preferred_element_type=jnp.float32)
    h2 = jnp.maximum(h2 + b2_ref[...], 0.0)                     # [TB, 128]

    # fc3: weights padded to [128, 128] so the output slab is lane-dense
    # (unmasked vst); real logits live in columns [:OUTPUT_SIZE].
    out = jnp.dot(h2, w3_ref[...], preferred_element_type=jnp.float32)
    o_ref[...] = (out + b3_ref[...]).astype(o_ref.dtype)        # [TB, 128]


def dqn_forward(x, params, tile_b=None):
    """x: [B, INPUT_SIZE] float32. params: dict of weights/biases.

    Returns [B, OUTPUT_SIZE] float32 Q-values.
    """
    w1, b1, w2, b2, w3, b3 = (params["w1"], params["b1"], params["w2"],
                              params["b2"], params["w3"], params["b3"])
    B = x.shape[0]
    if tile_b is None:
        tile_b = min(MAX_TILE_B, _round_up(B, 8))
    tile_b = _round_up(tile_b, 8)

    b_pad = _round_up(B, tile_b)
    if b_pad != B:
        x = jnp.pad(x, ((0, b_pad - B), (0, 0)))

    # Pad fc3 to a lane-dense [128, 128] output head (zeros beyond col 2).
    w3p = jnp.pad(w3, ((0, 0), (0, HIDDEN - OUTPUT_SIZE)))
    b3p = jnp.pad(b3, ((0, 0), (0, HIDDEN - OUTPUT_SIZE)))

    grid = (b_pad // tile_b,)

    def _resident(shape):
        # Weights/biases: same block every grid step -> stays in VMEM.
        return pl.BlockSpec(shape, lambda i: (0, 0))

    flops = 2 * b_pad * HIDDEN * (INPUT_SIZE + HIDDEN + HIDDEN)
    bytes_accessed = (
        b_pad * INPUT_SIZE * 4 + b_pad * HIDDEN * 4            # x in, slab out
        + (INPUT_SIZE * HIDDEN + 2 * HIDDEN * HIDDEN + 3 * HIDDEN) * 4)  # params

    out = pl.pallas_call(
        _dqn_kernel,
        out_shape=jax.ShapeDtypeStruct((b_pad, HIDDEN), jnp.float32),
        grid=grid,
        in_specs=[
            pl.BlockSpec((tile_b, INPUT_SIZE), lambda i: (i, 0)),   # x tile
            _resident((INPUT_SIZE, HIDDEN)),                        # w1
            _resident((1, HIDDEN)),                                 # b1
            _resident((HIDDEN, HIDDEN)),                            # w2
            _resident((1, HIDDEN)),                                 # b2
            _resident((HIDDEN, HIDDEN)),                            # w3 (padded)
            _resident((1, HIDDEN)),                                 # b3 (padded)
        ],
        out_specs=pl.BlockSpec((tile_b, HIDDEN), lambda i: (i, 0)),
        compiler_params=pltpu.CompilerParams(
            dimension_semantics=("parallel",)),
        cost_estimate=pl.CostEstimate(
            flops=flops, transcendentals=0, bytes_accessed=bytes_accessed),
    )(x, w1, b1, w2, b2, w3p, b3p)

    return out[:B, :OUTPUT_SIZE]


def init_params(key):
    """Deterministic init mimicking PyTorch's Linear default (U(-1/sqrt(fan_in), +))."""
    ks = jax.random.split(key, 6)

    def linear(kw, kb, fan_in, fan_out):
        bound = 1.0 / jnp.sqrt(jnp.float32(fan_in))
        w = jax.random.uniform(kw, (fan_in, fan_out), jnp.float32, -bound, bound)
        b = jax.random.uniform(kb, (1, fan_out), jnp.float32, -bound, bound)
        return w, b

    w1, b1 = linear(ks[0], ks[1], INPUT_SIZE, HIDDEN)
    w2, b2 = linear(ks[2], ks[3], HIDDEN, HIDDEN)
    w3, b3 = linear(ks[4], ks[5], HIDDEN, OUTPUT_SIZE)
    return {"w1": w1, "b1": b1, "w2": w2, "b2": b2, "w3": w3, "b3": b3}


def _reference(x, p):
    h1 = jnp.maximum(x @ p["w1"] + p["b1"], 0.0)
    h2 = jnp.maximum(h1 @ p["w2"] + p["b2"], 0.0)
    return h2 @ p["w3"] + p["b3"]


if __name__ == "__main__":
    key = jax.random.PRNGKey(0)
    k_params, k_x1, k_x2 = jax.random.split(key, 3)

    params = init_params(k_params)

    # Small single-tile case (B=8, matches CartPole replay mini-batch scale).
    batch = 8
    x = jax.random.normal(k_x1, (batch, INPUT_SIZE), jnp.float32)
    out = jax.block_until_ready(dqn_forward(x, params))
    ref = _reference(x, params)
    assert out.shape == (batch, OUTPUT_SIZE)
    assert jnp.allclose(out, ref, atol=1e-5, rtol=1e-5)

    # Multi-tile case exercising the batch grid + padding path.
    batch2 = 1000
    x2 = jax.random.normal(k_x2, (batch2, INPUT_SIZE), jnp.float32)
    out2 = jax.block_until_ready(dqn_forward(x2, params, tile_b=512))
    ref2 = _reference(x2, params)
    assert out2.shape == (batch2, OUTPUT_SIZE)
    assert jnp.allclose(out2, ref2, atol=1e-5, rtol=1e-5)

    print("KERNEL_OK")
</pallas_src>

<mosaic_0001>
module attributes {stable_mosaic.version = 11 : i64} {
  func.func @_dqn_kernel(%arg0: i32, %arg1: memref<8x4xf32, #tpu.memory_space<vmem>>, %arg2: memref<4x128xf32, #tpu.memory_space<vmem>>, %arg3: memref<1x128xf32, #tpu.memory_space<vmem>>, %arg4: memref<128x128xf32, #tpu.memory_space<vmem>>, %arg5: memref<1x128xf32, #tpu.memory_space<vmem>>, %arg6: memref<128x128xf32, #tpu.memory_space<vmem>>, %arg7: memref<1x128xf32, #tpu.memory_space<vmem>>, %arg8: memref<8x128xf32, #tpu.memory_space<vmem>>) attributes {dimension_semantics = [#tpu.dimension_semantics<parallel>], iteration_bounds = array<i64: 1>, scalar_prefetch = 0 : i64, scratch_operands = 0 : i64, tpu.core_type = #tpu.core_type<tc>, window_params = [{transform_indices = @transform_0, window_bounds = array<i64: 8, 4>}, {pipeline_mode = #tpu.pipeline_mode<synchronous>, transform_indices = @transform_1, window_bounds = array<i64: 4, 128>}, {pipeline_mode = #tpu.pipeline_mode<synchronous>, transform_indices = @transform_2, window_bounds = array<i64: 1, 128>}, {pipeline_mode = #tpu.pipeline_mode<synchronous>, transform_indices = @transform_3, window_bounds = array<i64: 128, 128>}, {pipeline_mode = #tpu.pipeline_mode<synchronous>, transform_indices = @transform_4, window_bounds = array<i64: 1, 128>}, {pipeline_mode = #tpu.pipeline_mode<synchronous>, transform_indices = @transform_5, window_bounds = array<i64: 128, 128>}, {pipeline_mode = #tpu.pipeline_mode<synchronous>, transform_indices = @transform_6, window_bounds = array<i64: 1, 128>}, {transform_indices = @transform_7, window_bounds = array<i64: 8, 128>}]} {
    %c0 = arith.constant 0 : index
    %c0_0 = arith.constant 0 : index
    %0 = vector.load %arg1[%c0, %c0_0] : memref<8x4xf32, #tpu.memory_space<vmem>>, vector<8x4xf32>
    %c0_1 = arith.constant 0 : index
    %c0_2 = arith.constant 0 : index
    %1 = vector.load %arg3[%c0_1, %c0_2] : memref<1x128xf32, #tpu.memory_space<vmem>>, vector<1x128xf32>
    %2 = vector.shape_cast %1 : vector<1x128xf32> to vector<1x128xf32>
    %3 = vector.broadcast %2 : vector<1x128xf32> to vector<8x128xf32>
    %4 = vector.extract_strided_slice %0 {offsets = [0, 0], sizes = [8, 1], strides = [1, 1]} : vector<8x4xf32> to vector<8x1xf32>
    %c0_3 = arith.constant 0 : index
    %c0_4 = arith.constant 0 : index
    %5 = vector.load %arg2[%c0_3, %c0_4] : memref<4x128xf32, #tpu.memory_space<vmem>>, vector<1x128xf32>
    %6 = vector.broadcast %4 : vector<8x1xf32> to vector<8x128xf32>
    %7 = vector.broadcast %5 : vector<1x128xf32> to vector<8x128xf32>
    %8 = arith.mulf %6, %7 : vector<8x128xf32>
    %9 = arith.addf %3, %8 : vector<8x128xf32>
    %10 = vector.extract_strided_slice %0 {offsets = [0, 1], sizes = [8, 1], strides = [1, 1]} : vector<8x4xf32> to vector<8x1xf32>
    %c1 = arith.constant 1 : index
    %c0_5 = arith.constant 0 : index
    %11 = vector.load %arg2[%c1, %c0_5] : memref<4x128xf32, #tpu.memory_space<vmem>>, vector<1x128xf32>
    %12 = vector.broadcast %10 : vector<8x1xf32> to vector<8x128xf32>
    %13 = vector.broadcast %11 : vector<1x128xf32> to vector<8x128xf32>
    %14 = arith.mulf %12, %13 : vector<8x128xf32>
    %15 = arith.addf %9, %14 : vector<8x128xf32>
    %16 = vector.extract_strided_slice %0 {offsets = [0, 2], sizes = [8, 1], strides = [1, 1]} : vector<8x4xf32> to vector<8x1xf32>
    %c2 = arith.constant 2 : index
    %c0_6 = arith.constant 0 : index
    %17 = vector.load %arg2[%c2, %c0_6] : memref<4x128xf32, #tpu.memory_space<vmem>>, vector<1x128xf32>
    %18 = vector.broadcast %16 : vector<8x1xf32> to vector<8x128xf32>
    %19 = vector.broadcast %17 : vector<1x128xf32> to vector<8x128xf32>
    %20 = arith.mulf %18, %19 : vector<8x128xf32>
    %21 = arith.addf %15, %20 : vector<8x128xf32>
    %22 = vector.extract_strided_slice %0 {offsets = [0, 3], sizes = [8, 1], strides = [1, 1]} : vector<8x4xf32> to vector<8x1xf32>
    %c3 = arith.constant 3 : index
    %c0_7 = arith.constant 0 : index
    %23 = vector.load %arg2[%c3, %c0_7] : memref<4x128xf32, #tpu.memory_space<vmem>>, vector<1x128xf32>
    %24 = vector.broadcast %22 : vector<8x1xf32> to vector<8x128xf32>
    %25 = vector.broadcast %23 : vector<1x128xf32> to vector<8x128xf32>
    %26 = arith.mulf %24, %25 : vector<8x128xf32>
    %27 = arith.addf %21, %26 : vector<8x128xf32>
    %cst = arith.constant 0.000000e+00 : f32
    %28 = vector.broadcast %cst : f32 to vector<8x128xf32>
    %29 = arith.maximumf %27, %28 : vector<8x128xf32>
    %c0_8 = arith.constant 0 : index
    %c0_9 = arith.constant 0 : index
    %30 = vector.load %arg4[%c0_8, %c0_9] : memref<128x128xf32, #tpu.memory_space<vmem>>, vector<128x128xf32>
    %cst_10 = arith.constant dense<0.000000e+00> : vector<8x128xf32>
    %31 = tpu.matmul %29, %30, %cst_10 {dimension_numbers = #tpu.dot_dimension_numbers<[1], [0], [0], [1], [0, 0, 1, 1], [], []>} : vector<8x128xf32>, vector<128x128xf32>, vector<8x128xf32> -> vector<8x128xf32>
    %c0_11 = arith.constant 0 : index
    %c0_12 = arith.constant 0 : index
    %32 = vector.load %arg5[%c0_11, %c0_12] : memref<1x128xf32, #tpu.memory_space<vmem>>, vector<1x128xf32>
    %33 = vector.broadcast %32 : vector<1x128xf32> to vector<8x128xf32>
    %34 = arith.addf %31, %33 : vector<8x128xf32>
    %cst_13 = arith.constant 0.000000e+00 : f32
    %35 = vector.broadcast %cst_13 : f32 to vector<8x128xf32>
    %36 = arith.maximumf %34, %35 : vector<8x128xf32>
    %c0_14 = arith.constant 0 : index
    %c0_15 = arith.constant 0 : index
    %37 = vector.load %arg6[%c0_14, %c0_15] : memref<128x128xf32, #tpu.memory_space<vmem>>, vector<128x128xf32>
    %cst_16 = arith.constant dense<0.000000e+00> : vector<8x128xf32>
    %38 = tpu.matmul %36, %37, %cst_16 {dimension_numbers = #tpu.dot_dimension_numbers<[1], [0], [0], [1], [0, 0, 1, 1], [], []>} : vector<8x128xf32>, vector<128x128xf32>, vector<8x128xf32> -> vector<8x128xf32>
    %c0_17 = arith.constant 0 : index
    %c0_18 = arith.constant 0 : index
    %39 = vector.load %arg7[%c0_17, %c0_18] : memref<1x128xf32, #tpu.memory_space<vmem>>, vector<1x128xf32>
    %40 = vector.broadcast %39 : vector<1x128xf32> to vector<8x128xf32>
    %41 = arith.addf %38, %40 : vector<8x128xf32>
    %c0_19 = arith.constant 0 : index
    %c0_20 = arith.constant 0 : index
    %42 = vector.load %arg8[%c0_19, %c0_20] : memref<8x128xf32, #tpu.memory_space<vmem>>, vector<8x128xf32>
    tpu.vector_store %arg8[%c0_19, %c0_20], %41 {strides = array<i32>} : memref<8x128xf32, #tpu.memory_space<vmem>>, vector<8x128xf32>,
    return
  }
  func.func @transform_0(%arg0: i32) -> (i32, i32) {
    %c0_i32 = arith.constant 0 : i32
    %c0_i32_0 = arith.constant 0 : i32
    return %arg0, %c0_i32 : i32, i32
  }
  func.func @transform_1(%arg0: i32) -> (i32, i32) {
    %c0_i32 = arith.constant 0 : i32
    %c0_i32_0 = arith.constant 0 : i32
    %c0_i32_1 = arith.constant 0 : i32
    return %c0_i32, %c0_i32_0 : i32, i32
  }
  func.func @transform_2(%arg0: i32) -> (i32, i32) {
    %c0_i32 = arith.constant 0 : i32
    %c0_i32_0 = arith.constant 0 : i32
    %c0_i32_1 = arith.constant 0 : i32
    return %c0_i32, %c0_i32_0 : i32, i32
  }
  func.func @transform_3(%arg0: i32) -> (i32, i32) {
    %c0_i32 = arith.constant 0 : i32
    %c0_i32_0 = arith.constant 0 : i32
    %c0_i32_1 = arith.constant 0 : i32
    return %c0_i32, %c0_i32_0 : i32, i32
  }
  func.func @transform_4(%arg0: i32) -> (i32, i32) {
    %c0_i32 = arith.constant 0 : i32
    %c0_i32_0 = arith.constant 0 : i32
    %c0_i32_1 = arith.constant 0 : i32
    return %c0_i32, %c0_i32_0 : i32, i32
  }
  func.func @transform_5(%arg0: i32) -> (i32, i32) {
    %c0_i32 = arith.constant 0 : i32
    %c0_i32_0 = arith.constant 0 : i32
    %c0_i32_1 = arith.constant 0 : i32
    return %c0_i32, %c0_i32_0 : i32, i32
  }
  func.func @transform_6(%arg0: i32) -> (i32, i32) {
    %c0_i32 = arith.constant 0 : i32
    %c0_i32_0 = arith.constant 0 : i32
    %c0_i32_1 = arith.constant 0 : i32
    return %c0_i32, %c0_i32_0 : i32, i32
  }
  func.func @transform_7(%arg0: i32) -> (i32, i32) {
    %c0_i32 = arith.constant 0 : i32
    %c0_i32_0 = arith.constant 0 : i32
    return %arg0, %c0_i32 : i32, i32
  }
}

</mosaic_0001>

<bundles_post_ra>
// kernel: tpu_custom_call.1
= control target key start
LH: loop header
LB: loop body
LE: loop exit
PB: predicated region body
PF: predicated region fallthrough
CT: control target
= control target key end

     0   :  { %12 = vsyncpa [#allocation3], 0  ;;  %s379_s0 = inlined_call_operand.vmem [shape: f32[8,4], index: 0, kind: input, shape index: {}]   ;;  %s380_s1 = inlined_call_operand.vmem [shape: f32[4,128], index: 1, kind: input, shape index: {}]   ;;  %s381_s2 = inlined_call_operand.vmem [shape: f32[1,128], index: 2, kind: input, shape index: {}]   ;;  %s382_s3 = inlined_call_operand.hbm [shape: f32[128,128], index: 3, kind: input, shape index: {}]   ;;  %s383_s4 = inlined_call_operand.vmem [shape: f32[1,128], index: 4, kind: input, shape index: {}]   ;;  %s384_s5 = inlined_call_operand.hbm [shape: f32[128,128], index: 5, kind: input, shape index: {}]   ;;  %s385_s6 = inlined_call_operand.vmem [shape: f32[1,128], index: 6, kind: input, shape index: {}]   ;;  %s386_s7 = inlined_call_operand.hbm [shape: f32[8,128], index: 7, kind: output, shape index: {}]  }
   0x1   :  { %13 = vsyncpa [#allocation6], 0 }
   0x2   :  { %14 = vsyncpa [#allocation4], 0  ;;  %s25_s26 = sshll.u32 %s382_s3, 4  ;;  %s297_s27 = smov [#allocation2]   ;;  %s26_s26 = int_to_ptr.hbm [resolvable:$true] %s25_s26 }
   0x3   :  { %s27_s28 = sshll.u32 %s297_s27, 4  ;;  %s40_s8 = sshll.u32 %s384_s5, 4  ;;  %s28_s28 = int_to_ptr.vmem [resolvable:$true] %s27_s28  ;;  %s41_s8 = int_to_ptr.hbm [resolvable:$true] %s40_s8 }
   0x4   :  { %s298_s9 = smov 128   ;;  %s299_s10 = smov 8  }
   0x5   :  { %33 = dma.hbm_to_vmem [thread:$0]  %s26_s26, 2048, %s28_s28, [#allocation3], %s298_s9, %s298_s9, %s299_s10  }
   0x6   :  { %s300_s11 = smov [#allocation5]  }
   0x7   :  { %s42_s12 = sshll.u32 %s300_s11, 4  ;;  %s43_s12 = int_to_ptr.vmem [resolvable:$true] %s42_s12 }
   0x8   :  { %48 = dma.hbm_to_vmem [thread:$0]  %s41_s8, 2048, %s43_s12, [#allocation6], %s298_s9, %s298_s9, %s299_s10  }
   0x9   :  { %291 = dma.done.wait [#allocation3], 2048  }
   0xa   :  { %292 = vsyncadd [#allocation3], 4294965248 }
   0xb   :  { %293 = dma.done.wait [#allocation6], 2048  }
   0xc   :  { %294 = vsyncadd [#allocation6], 4294965248  ;;  %v301_v0 = vmov 0   ;;  %v302_v1 = vmov 2   ;;  %v59_v2 = vld [vmem:[%s379_s0] sm:$0xff]  ;;  %v113_v3 = vld [vmem:[#allocation2 + $0x78] sm:$0xff] }
   0xd   :  { %207 = vset.pattern.permute.xlu0 %v301_v0  ;;  %209 = vset.pattern.permute.xlu1 %v302_v1  ;;  %v112_v4 = vld [vmem:[#allocation2 + $0x70] sm:$0xff]  ;;  %v111_v5 = vld [vmem:[#allocation2 + $0x68] sm:$0xff]  ;;  %v110_v6 = vld [vmem:[#allocation2 + $0x60] sm:$0xff]  ;;  %v303_v8 = vmov 1   ;;  %v304_v9 = vmov 3   ;;  %s305_s24 = smov [#allocation7]  }
   0xe   :  { %67 = vperm.xlu0 %207, %v59_v2   ;;  %83 = vperm.xlu1 %209, %v59_v2   ;;  %v109_v7 = vld [vmem:[#allocation2 + $0x58] sm:$0xff]  ;;  %v108_v10 = vld [vmem:[#allocation2 + $0x50] sm:$0xff]  ;;  %v107_v11 = vld [vmem:[#allocation2 + $0x48] sm:$0xff]  ;;  %s185_s25 = sshll.u32 %s305_s24, 4  ;;  %s187_s28 = sshll.u32 %s386_s7, 4  ;;  %s186_s25 = int_to_ptr.vmem [resolvable:$true] %s185_s25  ;;  %s188_s28 = int_to_ptr.hbm [resolvable:$true] %s187_s28 }
   0xf   :  { %118 = vmatpush.msra.mxu0 %v113_v3  ;;  %v106_v12 = vld [vmem:[#allocation2 + $0x40] sm:$0xff]  ;;  %v105_v13 = vld [vmem:[#allocation2 + $0x38] sm:$0xff]  ;;  %v104_v14 = vld [vmem:[#allocation2 + $0x30] sm:$0xff] }
  0x10   :  { %v103_v15 = vld [vmem:[#allocation2 + $0x28] sm:$0xff]  ;;  %v102_v16 = vld [vmem:[#allocation2 + $0x20] sm:$0xff]  ;;  %v101_v17 = vld [vmem:[#allocation2 + $0x18] sm:$0xff] }
  0x11   :  { %119 = vmatpush.msra.mxu0 %v112_v4  ;;  %v100_v18 = vld [vmem:[#allocation2 + $0x10] sm:$0xff]  ;;  %v99_v19 = vld [vmem:[#allocation2 + $0x8] sm:$0xff]  ;;  %v98_v20 = vld [vmem:[#allocation2] sm:$0xff] }
  0x12   :  { %v154_v21 = vld [vmem:[#allocation5 + $0x78] sm:$0xff]  ;;  %v153_v22 = vld [vmem:[#allocation5 + $0x70] sm:$0xff]  ;;  %v152_v23 = vld [vmem:[#allocation5 + $0x68] sm:$0xff] }
  0x13   :  { %120 = vmatpush.msra.mxu0 %v111_v5  ;;  %159 = vmatpush.msra.mxu1 %v154_v21  ;;  %v151_v24 = vld [vmem:[#allocation5 + $0x60] sm:$0xff]  ;;  %v150_v25 = vld [vmem:[#allocation5 + $0x58] sm:$0xff]  ;;  %v149_v26 = vld [vmem:[#allocation5 + $0x50] sm:$0xff] }
  0x14   :  { %v148_v27 = vld [vmem:[#allocation5 + $0x48] sm:$0xff]  ;;  %v147_v30 = vld [vmem:[#allocation5 + $0x40] sm:$0xff]  ;;  %v146_v32 = vld [vmem:[#allocation5 + $0x38] sm:$0xff] }
  0x15   :  { %121 = vmatpush.msra.mxu0 %v110_v6  ;;  %160 = vmatpush.msra.mxu1 %v153_v22  ;;  %v213_v31 = vld [vmem:[%s380_s1] ss:$0 sm:$0xff]  ;;  %v145_v33 = vld [vmem:[#allocation5 + $0x30] sm:$0xff]  ;;  %v215_v36 = vld [vmem:[%s380_s1 + $0x1] ss:$0 sm:$0xff] }
  0x16   :  { %208 = vset.pattern.permute.xlu0 %v303_v8  ;;  %210 = vset.pattern.permute.xlu1 %v304_v9  ;;  %v212_v34 = vld [vmem:[%s381_s2] ss:$0 sm:$0xff]  ;;  %v144_v37 = vld [vmem:[#allocation5 + $0x28] sm:$0xff]  ;;  %v214_v38 = vld [vmem:[%s380_s1 + $0x2] ss:$0 sm:$0xff] }
  0x17   :  { %75 = vperm.xlu0 %208, %v59_v2   ;;  %91 = vperm.xlu1 %210, %v59_v2   ;;  %v216_v39 = vld [vmem:[%s380_s1 + $0x3] ss:$0 sm:$0xff]  ;;  %v142_v45 = vld [vmem:[#allocation5 + $0x18] sm:$0xff]  ;;  %v141_v52 = vld [vmem:[#allocation5 + $0x10] sm:$0xff] }
  0x18   :  { %122 = vmatpush.msra.mxu0 %v109_v7  ;;  %161 = vmatpush.msra.mxu1 %v152_v23  ;;  %v143_v40 = vld [vmem:[#allocation5 + $0x20] sm:$0xff]  ;;  %v140_v53 = vld [vmem:[#allocation5 + $0x8] sm:$0xff] }
  0x19   :  { %v139_v54 = vld [vmem:[#allocation5] sm:$0xff] }
  0x1a   :  { %123 = vmatpush.msra.mxu0 %v108_v10  ;;  %162 = vmatpush.msra.mxu1 %v151_v24  ;;  %v217_v55 = vld [vmem:[%s383_s4] ss:$0 sm:$0xff] }
  0x1b   :  { %v218_v59 = vld [vmem:[%s385_s6] ss:$0 sm:$0xff] }
  0x1c   :  { %124 = vmatpush.msra.mxu0 %v107_v11  ;;  %163 = vmatpush.msra.mxu1 %v150_v25 }
  0x1e   :  { %125 = vmatpush.msra.mxu0 %v106_v12  ;;  %164 = vmatpush.msra.mxu1 %v149_v26 }
  0x1f   :  { %211 = vset.pattern.permute.xlu0 %v304_v9 }
  0x20   :  { %126 = vmatpush.msra.mxu0 %v105_v13  ;;  %165 = vmatpush.msra.mxu1 %v148_v27 }
  0x22   :  { %127 = vmatpush.msra.mxu0 %v104_v14  ;;  %166 = vmatpush.msra.mxu1 %v147_v30 }
  0x24   :  { %128 = vmatpush.msra.mxu0 %v103_v15  ;;  %167 = vmatpush.msra.mxu1 %v146_v32 }
  0x26   :  { %129 = vmatpush.msra.mxu0 %v102_v16  ;;  %168 = vmatpush.msra.mxu1 %v145_v33 }
  0x28   :  { %130 = vmatpush.msra.mxu0 %v101_v17  ;;  %169 = vmatpush.msra.mxu1 %v144_v37 }
  0x2a   :  { %131 = vmatpush.msra.mxu0 %v100_v18  ;;  %170 = vmatpush.msra.mxu1 %v143_v40 }
  0x2c   :  { %132 = vmatpush.msra.mxu0 %v99_v19  ;;  %171 = vmatpush.msra.mxu1 %v142_v45 }
  0x2e   :  { %133 = vmatpush.msra.mxu0 %v98_v20  ;;  %172 = vmatpush.msra.mxu1 %v141_v52 }
  0x30   :  { %173 = vmatpush.msra.mxu1 %v140_v53 }
  0x32   :  { %174 = vmatpush.msra.mxu1 %v139_v54 }
  0x80   :  { %v68_v28 = vpop.permute.xlu0 %67  ;;  %v84_v29 = vpop.permute.xlu1 %83 }
  0x81   :  { %v71_v35 = vmul.f32 %v213_v31, %v68_v28  ;;  %v87_v46 = vmul.f32 %v214_v38, %v84_v29 }
  0x83   :  { %v72_v43 = vadd.f32 %v212_v34, %v71_v35 }
  0x89   :  { %v76_v41 = vpop.permute.xlu0 %75  ;;  %v92_v42 = vpop.permute.xlu1 %91 }
  0x8a   :  { %v79_v44 = vmul.f32 %v215_v36, %v76_v41  ;;  %v95_v48 = vmul.f32 %v216_v39, %v92_v42 }
  0x8c   :  { %v80_v47 = vadd.f32 %v79_v44, %v72_v43 }
  0x8e   :  { %v88_v49 = vadd.f32 %v87_v46, %v80_v47 }
  0x90   :  { %v96_v50 = vadd.f32 %v95_v48, %v88_v49 }
  0x92   :  { %v97_v51 = vmax.f32 %v96_v50, 0.0 }
  0x94   :  { %134 = vmatmul.f32.vlgmr.msra.gmra.mxu0 %v97_v51 }
 0x111   :  { %v135_v56 = vpop.f32.mrf.mxu0 }
 0x112   :  { %v136_v57 = vadd.f32 %v217_v55, %v135_v56 }
 0x114   :  { %v138_v58 = vmax.f32 %v136_v57, 0.0 }
 0x116   :  { %175 = vmatmul.f32.vlgmr.msra.gmra.mxu1 %v138_v58 }
 0x193   :  { %v176_v60 = vpop.f32.mrf.mxu1 }
 0x194   :  { %v177_v61 = vadd.f32 %v218_v59, %v176_v60 }
 0x196   :  { %179 = vst [vmem:[#allocation7] sm:$0xff] %v177_v61 }
 0x197   :  { %190 = dma.vmem_to_hbm [thread:$0]  %s186_s25, 128, %s188_s28, [#allocation4]  }
 0x198   :  { %295 = dma.done.wait [#allocation4], 128  }
 0x199   :  { %296 = vsyncadd [#allocation4], 4294967168 }
 0x19a   :  { %195 = vsyncpa [#allocation3], 1 }
 0x19b   :  { %196 = vsyncpa [#allocation6], 1 }
 0x19c   :  { %197 = vsyncpa [#allocation4], 1 }

</bundles_post_ra>
